<compile_context>
chip_gen: v7x
topology: tpu7x:2x2x1
jax: 0.10.0
libtpu: 0.0.40
codegen_flags: <defaults>
</compile_context>

<pallas_src>
import jax
import jax.numpy as jnp
from jax import lax
from jax.experimental import pallas as pl
from jax.experimental.pallas import tpu as pltpu


def _round_up(x, m):
    return (x + m - 1) // m * m


def _choose_bm(B):
    """Batch-tile rows. Large tiles amortize the ~0.35us/step overhead and approach
    the HBM roofline; for large batches keep >=2 grid steps so v7x's two
    TensorCores both get work. Multi-tile bm is a multiple of 128 because it is
    the lane dimension of the (1, bm) output block."""
    Bp = _round_up(B, 8)
    if Bp <= 512:
        return Bp                                   # single tile (block == full array)
    n_tiles = max(2, -(-Bp // 1024))                # >=2 tiles, each <= ~1024 rows
    return _round_up(-(-Bp // n_tiles), 128)


def fusion_head_kernel(xc_ref, xd_ref, w1c_ref, w1d_ref, b1_ref,
                       w2_ref, b2_ref, w3_ref, b3_ref, out_ref):
    # Activations may arrive f32 or bf16; the cast is a no-op if the upstream
    # producer already emits bf16 (preferred: halves the binding activation DMA).
    xc = xc_ref[...].astype(jnp.bfloat16)
    xd = xd_ref[...].astype(jnp.bfloat16)

    # Fused concat: [x_cell, drug] @ w1  ==  x_cell @ w1_cell + drug @ w1_drug
    h1 = (jnp.dot(xc, w1c_ref[...], preferred_element_type=jnp.float32)
          + jnp.dot(xd, w1d_ref[...], preferred_element_type=jnp.float32)
          + b1_ref[...])
    h1 = jnp.maximum(h1, 0.0)            # ReLU; Dropout is identity at inference

    h2 = jnp.dot(h1.astype(jnp.bfloat16), w2_ref[...],
                 preferred_element_type=jnp.float32) + b2_ref[...]
    h2 = jnp.maximum(h2, 0.0)

    # Final Linear (K -> 1), lane-dense: (1, K) contracted with (bm, K) -> (1, bm),
    # so the store is an unmasked full-lane row instead of a 1-lane column.
    out = lax.dot_general(w3_ref[...], h2.astype(jnp.bfloat16),
                          dimension_numbers=(((1,), (1,)), ((), ())),
                          preferred_element_type=jnp.float32)
    out_ref[...] = (out + b3_ref[0, 0]).astype(out_ref.dtype)


def fusion_head_forward(x_cell_embed, drug_embed, packed_params):
    """Calls the fused kernel. Weights/biases stay VMEM-resident across batch tiles."""
    w1c, w1d, b1, w2, b2, w3, b3 = packed_params
    B, d_cell = x_cell_embed.shape
    _, d_drug = drug_embed.shape
    d_h1p = w1c.shape[1]
    d_h2p = w2.shape[1]

    bm = _choose_bm(B)
    padded_B = _round_up(B, bm)
    if padded_B != B:
        pad = padded_B - B
        x_cell_embed = jnp.pad(x_cell_embed, ((0, pad), (0, 0)))
        drug_embed = jnp.pad(drug_embed, ((0, pad), (0, 0)))
    n_tiles = padded_B // bm

    # Advisory cost hint so XLA can schedule around this short custom call.
    act_bytes = (x_cell_embed.size * x_cell_embed.dtype.itemsize
                 + drug_embed.size * drug_embed.dtype.itemsize)
    wgt_bytes = sum(int(a.size) * a.dtype.itemsize
                    for a in (w1c, w1d, b1, w2, b2, w3, b3))
    out_bytes = padded_B * 4
    flops = 2 * padded_B * ((d_cell + d_drug) * d_h1p + d_h1p * d_h2p + d_h2p)

    out = pl.pallas_call(
        fusion_head_kernel,
        out_shape=jax.ShapeDtypeStruct((1, padded_B), jnp.float32),
        grid=(n_tiles,),
        in_specs=[
            pl.BlockSpec((bm, d_cell), lambda i: (i, 0)),
            pl.BlockSpec((bm, d_drug), lambda i: (i, 0)),
            pl.BlockSpec((d_cell, d_h1p), lambda i: (0, 0)),
            pl.BlockSpec((d_drug, d_h1p), lambda i: (0, 0)),
            pl.BlockSpec((1, d_h1p), lambda i: (0, 0)),
            pl.BlockSpec((d_h1p, d_h2p), lambda i: (0, 0)),
            pl.BlockSpec((1, d_h2p), lambda i: (0, 0)),
            pl.BlockSpec((1, d_h2p), lambda i: (0, 0)),
            pl.BlockSpec(memory_space=pltpu.MemorySpace.SMEM),   # b3 scalar
        ],
        out_specs=pl.BlockSpec((1, bm), lambda i: (0, i)),       # lane-dense output row
        compiler_params=pltpu.CompilerParams(
            dimension_semantics=("parallel",)),
        cost_estimate=pl.CostEstimate(
            flops=flops, transcendentals=0,
            bytes_accessed=act_bytes + wgt_bytes + out_bytes),
    )(x_cell_embed, drug_embed, w1c, w1d, b1, w2, b2, w3, b3)

    # Tiles are written in batch order along the lane axis -> plain reshape + slice.
    return out.reshape(padded_B, 1)[:B]


def init_params(key, out_channels):
    """Logical f32 params matching the PyTorch module (weights stored (in, out),
    xavier-normal per init_weights(), zero biases)."""
    d_in = out_channels * 40
    d_h1 = out_channels * 20
    d_h2 = out_channels * 10
    d_out = 1

    def xavier_normal(k, fan_in, fan_out):
        std = (2.0 / (fan_in + fan_out)) ** 0.5
        return std * jax.random.normal(k, (fan_in, fan_out), dtype=jnp.float32)

    k1, k2, k3 = jax.random.split(key, 3)
    w1 = xavier_normal(k1, d_in, d_h1)
    b1 = jnp.zeros((d_h1,), jnp.float32)
    w2 = xavier_normal(k2, d_h1, d_h2)
    b2 = jnp.zeros((d_h2,), jnp.float32)
    w3 = xavier_normal(k3, d_h2, d_out)
    b3 = jnp.zeros((d_out,), jnp.float32)
    return (w1, b1, w2, b2, w3, b3)


def pack_params(params, d_cell):
    """One-time repack (outside the hot path): split w1 at the concat boundary,
    zero-pad hidden dims to lane multiples of 128, cast matmul weights to bf16,
    reshape biases to TPU-friendly 2-D rows. Padding is a mathematical no-op
    (pad bias=0, ReLU(0)=0 feeds zero weight rows/cols)."""
    w1, b1, w2, b2, w3, b3 = params
    d_h1 = w1.shape[1]
    d_h2 = w2.shape[1]
    d_h1p = _round_up(d_h1, 128)
    d_h2p = _round_up(d_h2, 128)

    w1p = jnp.pad(w1, ((0, 0), (0, d_h1p - d_h1)))
    w1c = w1p[:d_cell].astype(jnp.bfloat16)
    w1d = w1p[d_cell:].astype(jnp.bfloat16)
    b1p = jnp.pad(b1, (0, d_h1p - d_h1)).reshape(1, d_h1p)

    w2p = jnp.pad(w2, ((0, d_h1p - d_h1), (0, d_h2p - d_h2))).astype(jnp.bfloat16)
    b2p = jnp.pad(b2, (0, d_h2p - d_h2)).reshape(1, d_h2p)

    # Final layer: (1, d_h2p) bf16 row for the M=1 MXU matmul; b3 as (1,1) SMEM scalar.
    w3p = jnp.pad(w3[:, 0], (0, d_h2p - d_h2)).reshape(1, d_h2p).astype(jnp.bfloat16)
    b3p = b3.reshape(1, 1)
    return (w1c, w1d, b1p, w2p, b2p, w3p, b3p)


if __name__ == "__main__":
    # Small shapes consistent with the module: out_channels=8
    #   concat dim = oc*40 = 320, hidden1 = 160 (->256), hidden2 = 80 (->128), output = 1
    out_channels = 8
    B = 2
    d_cell = out_channels * 32   # 256
    d_drug = out_channels * 8    # 64  (256 + 64 = 320 = oc*40)

    key = jax.random.PRNGKey(0)
    k_cell, k_drug, k_params = jax.random.split(key, 3)

    x_cell_embed = jax.random.normal(k_cell, (B, d_cell), dtype=jnp.float32)
    drug_embed = jax.random.normal(k_drug, (B, d_drug), dtype=jnp.float32)

    params = init_params(k_params, out_channels)
    packed = pack_params(params, d_cell)

    out = fusion_head_forward(x_cell_embed, drug_embed, packed)
    out = jax.block_until_ready(out)

    # Reference in plain JAX, mirroring the kernel's bf16-operand / f32-accumulate precision.
    w1c, w1d, b1, w2, b2, w3, b3 = packed
    f32 = lambda a: a.astype(jnp.float32)
    bf = lambda a: a.astype(jnp.bfloat16).astype(jnp.float32)
    dot_hi = lambda a, b: jnp.dot(a, b, precision=lax.Precision.HIGHEST)
    h1 = jnp.maximum(dot_hi(bf(x_cell_embed), f32(w1c))
                     + dot_hi(bf(drug_embed), f32(w1d)) + b1, 0.0)
    h2 = jnp.maximum(dot_hi(bf(h1), f32(w2)) + b2, 0.0)
    ref = dot_hi(bf(h2), f32(w3).T) + b3

    assert out.shape == (B, 1)
    assert jnp.allclose(out, ref, atol=2e-3, rtol=2e-3), (out, ref)

    print("KERNEL_OK")
</pallas_src>

<mosaic_0001>
module attributes {stable_mosaic.version = 11 : i64} {
  func.func @fusion_head_kernel(%arg0: i32, %arg1: memref<8x256xf32, #tpu.memory_space<vmem>>, %arg2: memref<8x64xf32, #tpu.memory_space<vmem>>, %arg3: memref<256x256xbf16, #tpu.memory_space<vmem>>, %arg4: memref<64x256xbf16, #tpu.memory_space<vmem>>, %arg5: memref<1x256xf32, #tpu.memory_space<vmem>>, %arg6: memref<256x128xbf16, #tpu.memory_space<vmem>>, %arg7: memref<1x128xf32, #tpu.memory_space<vmem>>, %arg8: memref<1x128xbf16, #tpu.memory_space<vmem>>, %arg9: memref<1x1xf32, #tpu.memory_space<smem>>, %arg10: memref<1x8xf32, #tpu.memory_space<vmem>>) attributes {dimension_semantics = [#tpu.dimension_semantics<parallel>], iteration_bounds = array<i64: 1>, scalar_prefetch = 0 : i64, scratch_operands = 0 : i64, tpu.core_type = #tpu.core_type<tc>, window_params = [{transform_indices = @transform_0, window_bounds = array<i64: 8, 256>}, {transform_indices = @transform_1, window_bounds = array<i64: 8, 64>}, {pipeline_mode = #tpu.pipeline_mode<synchronous>, transform_indices = @transform_2, window_bounds = array<i64: 256, 256>}, {pipeline_mode = #tpu.pipeline_mode<synchronous>, transform_indices = @transform_3, window_bounds = array<i64: 64, 256>}, {pipeline_mode = #tpu.pipeline_mode<synchronous>, transform_indices = @transform_4, window_bounds = array<i64: 1, 256>}, {pipeline_mode = #tpu.pipeline_mode<synchronous>, transform_indices = @transform_5, window_bounds = array<i64: 256, 128>}, {pipeline_mode = #tpu.pipeline_mode<synchronous>, transform_indices = @transform_6, window_bounds = array<i64: 1, 128>}, {pipeline_mode = #tpu.pipeline_mode<synchronous>, transform_indices = @transform_7, window_bounds = array<i64: 1, 128>}, {transform_indices = @transform_8, window_bounds = array<i64: 1, 1>}, {transform_indices = @transform_9, window_bounds = array<i64: 1, 8>}]} {
    %c0 = arith.constant 0 : index
    %c0_0 = arith.constant 0 : index
    %0 = vector.load %arg1[%c0, %c0_0] : memref<8x256xf32, #tpu.memory_space<vmem>>, vector<8x256xf32>
    %1 = arith.truncf %0 : vector<8x256xf32> to vector<8x256xbf16>
    %c0_1 = arith.constant 0 : index
    %c0_2 = arith.constant 0 : index
    %2 = vector.load %arg2[%c0_1, %c0_2] : memref<8x64xf32, #tpu.memory_space<vmem>>, vector<8x64xf32>
    %3 = arith.truncf %2 : vector<8x64xf32> to vector<8x64xbf16>
    %c0_3 = arith.constant 0 : index
    %c0_4 = arith.constant 0 : index
    %4 = vector.load %arg3[%c0_3, %c0_4] : memref<256x256xbf16, #tpu.memory_space<vmem>>, vector<256x256xbf16>
    %cst = arith.constant dense<0.000000e+00> : vector<8x256xf32>
    %5 = tpu.matmul %1, %4, %cst {dimension_numbers = #tpu.dot_dimension_numbers<[1], [0], [0], [1], [0, 0, 1, 1], [], []>} : vector<8x256xbf16>, vector<256x256xbf16>, vector<8x256xf32> -> vector<8x256xf32>
    %c0_5 = arith.constant 0 : index
    %c0_6 = arith.constant 0 : index
    %6 = vector.load %arg4[%c0_5, %c0_6] : memref<64x256xbf16, #tpu.memory_space<vmem>>, vector<64x256xbf16>
    %cst_7 = arith.constant dense<0.000000e+00> : vector<8x256xf32>
    %7 = tpu.matmul %3, %6, %cst_7 {dimension_numbers = #tpu.dot_dimension_numbers<[1], [0], [0], [1], [0, 0, 1, 1], [], []>} : vector<8x64xbf16>, vector<64x256xbf16>, vector<8x256xf32> -> vector<8x256xf32>
    %8 = arith.addf %5, %7 : vector<8x256xf32>
    %c0_8 = arith.constant 0 : index
    %c0_9 = arith.constant 0 : index
    %9 = vector.load %arg5[%c0_8, %c0_9] : memref<1x256xf32, #tpu.memory_space<vmem>>, vector<1x256xf32>
    %10 = vector.broadcast %9 : vector<1x256xf32> to vector<8x256xf32>
    %11 = arith.addf %8, %10 : vector<8x256xf32>
    %cst_10 = arith.constant 0.000000e+00 : f32
    %12 = vector.broadcast %cst_10 : f32 to vector<8x256xf32>
    %13 = arith.maximumf %11, %12 : vector<8x256xf32>
    %14 = arith.truncf %13 : vector<8x256xf32> to vector<8x256xbf16>
    %c0_11 = arith.constant 0 : index
    %c0_12 = arith.constant 0 : index
    %15 = vector.load %arg6[%c0_11, %c0_12] : memref<256x128xbf16, #tpu.memory_space<vmem>>, vector<256x128xbf16>
    %cst_13 = arith.constant dense<0.000000e+00> : vector<8x128xf32>
    %16 = tpu.matmul %14, %15, %cst_13 {dimension_numbers = #tpu.dot_dimension_numbers<[1], [0], [0], [1], [0, 0, 1, 1], [], []>} : vector<8x256xbf16>, vector<256x128xbf16>, vector<8x128xf32> -> vector<8x128xf32>
    %c0_14 = arith.constant 0 : index
    %c0_15 = arith.constant 0 : index
    %17 = vector.load %arg7[%c0_14, %c0_15] : memref<1x128xf32, #tpu.memory_space<vmem>>, vector<1x128xf32>
    %18 = vector.broadcast %17 : vector<1x128xf32> to vector<8x128xf32>
    %19 = arith.addf %16, %18 : vector<8x128xf32>
    %cst_16 = arith.constant 0.000000e+00 : f32
    %20 = vector.broadcast %cst_16 : f32 to vector<8x128xf32>
    %21 = arith.maximumf %19, %20 : vector<8x128xf32>
    %c0_17 = arith.constant 0 : index
    %c0_18 = arith.constant 0 : index
    %22 = vector.load %arg8[%c0_17, %c0_18] : memref<1x128xbf16, #tpu.memory_space<vmem>>, vector<1x128xbf16>
    %23 = arith.truncf %21 : vector<8x128xf32> to vector<8x128xbf16>
    %cst_19 = arith.constant dense<0.000000e+00> : vector<1x8xf32>
    %24 = tpu.matmul %22, %23, %cst_19 {dimension_numbers = #tpu.dot_dimension_numbers<[1], [1], [0], [0], [0, 0, 1, 0], [], []>} : vector<1x128xbf16>, vector<8x128xbf16>, vector<1x8xf32> -> vector<1x8xf32>
    %c0_20 = arith.constant 0 : index
    %c0_21 = arith.constant 0 : index
    %25 = memref.load %arg9[%c0_20, %c0_21] : memref<1x1xf32, #tpu.memory_space<smem>>
    %26 = vector.broadcast %25 : f32 to vector<1x8xf32>
    %27 = arith.addf %24, %26 : vector<1x8xf32>
    %c0_22 = arith.constant 0 : index
    %c0_23 = arith.constant 0 : index
    %28 = vector.load %arg10[%c0_22, %c0_23] : memref<1x8xf32, #tpu.memory_space<vmem>>, vector<1x8xf32>
    tpu.vector_store %arg10[%c0_22, %c0_23], %27 {strides = array<i32>} : memref<1x8xf32, #tpu.memory_space<vmem>>, vector<1x8xf32>,
    return
  }
  func.func @transform_0(%arg0: i32) -> (i32, i32) {
    %c0_i32 = arith.constant 0 : i32
    %c0_i32_0 = arith.constant 0 : i32
    return %arg0, %c0_i32 : i32, i32
  }
  func.func @transform_1(%arg0: i32) -> (i32, i32) {
    %c0_i32 = arith.constant 0 : i32
    %c0_i32_0 = arith.constant 0 : i32
    return %arg0, %c0_i32 : i32, i32
  }
  func.func @transform_2(%arg0: i32) -> (i32, i32) {
    %c0_i32 = arith.constant 0 : i32
    %c0_i32_0 = arith.constant 0 : i32
    %c0_i32_1 = arith.constant 0 : i32
    return %c0_i32, %c0_i32_0 : i32, i32
  }
  func.func @transform_3(%arg0: i32) -> (i32, i32) {
    %c0_i32 = arith.constant 0 : i32
    %c0_i32_0 = arith.constant 0 : i32
    %c0_i32_1 = arith.constant 0 : i32
    return %c0_i32, %c0_i32_0 : i32, i32
  }
  func.func @transform_4(%arg0: i32) -> (i32, i32) {
    %c0_i32 = arith.constant 0 : i32
    %c0_i32_0 = arith.constant 0 : i32
    %c0_i32_1 = arith.constant 0 : i32
    return %c0_i32, %c0_i32_0 : i32, i32
  }
  func.func @transform_5(%arg0: i32) -> (i32, i32) {
    %c0_i32 = arith.constant 0 : i32
    %c0_i32_0 = arith.constant 0 : i32
    %c0_i32_1 = arith.constant 0 : i32
    return %c0_i32, %c0_i32_0 : i32, i32
  }
  func.func @transform_6(%arg0: i32) -> (i32, i32) {
    %c0_i32 = arith.constant 0 : i32
    %c0_i32_0 = arith.constant 0 : i32
    %c0_i32_1 = arith.constant 0 : i32
    return %c0_i32, %c0_i32_0 : i32, i32
  }
  func.func @transform_7(%arg0: i32) -> (i32, i32) {
    %c0_i32 = arith.constant 0 : i32
    %c0_i32_0 = arith.constant 0 : i32
    %c0_i32_1 = arith.constant 0 : i32
    return %c0_i32, %c0_i32_0 : i32, i32
  }
  func.func @transform_8(%arg0: i32) -> (i32, i32) {
    %c0_i32 = arith.constant 0 : i32
    %c0_i32_0 = arith.constant 0 : i32
    %c0_i32_1 = arith.constant 0 : i32
    return %c0_i32, %c0_i32_0 : i32, i32
  }
  func.func @transform_9(%arg0: i32) -> (i32, i32) {
    %c0_i32 = arith.constant 0 : i32
    %c0_i32_0 = arith.constant 0 : i32
    return %c0_i32, %arg0 : i32, i32
  }
}

</mosaic_0001>

<bundles_post_ra>
// kernel: tpu_custom_call.1
= control target key start
LH: loop header
LB: loop body
LE: loop exit
PB: predicated region body
PF: predicated region fallthrough
CT: control target
= control target key end

     0   :  { %15 = vsyncpa [#allocation4], 0  ;;  %s1158_s0 = inlined_call_operand.hbm [shape: f32[8,256], index: 0, kind: input, shape index: {}]   ;;  %s1159_s1 = inlined_call_operand.hbm [shape: f32[8,64], index: 1, kind: input, shape index: {}]   ;;  %s1160_s2 = inlined_call_operand.hbm [shape: bf16[256,256], index: 2, kind: input, shape index: {}]   ;;  %s1161_s3 = inlined_call_operand.hbm [shape: bf16[64,256], index: 3, kind: input, shape index: {}]   ;;  %s1162_s4 = inlined_call_operand.vmem [shape: f32[1,256], index: 4, kind: input, shape index: {}]   ;;  %s1163_s5 = inlined_call_operand.hbm [shape: bf16[256,128], index: 5, kind: input, shape index: {}]   ;;  %s1164_s6 = inlined_call_operand.vmem [shape: f32[1,128], index: 6, kind: input, shape index: {}]   ;;  %s1165_s7 = inlined_call_operand.vmem [shape: bf16[1,128], index: 7, kind: input, shape index: {}]   ;;  %s1166_s8 = inlined_call_operand.<no memory space> [shape: f32[1,1], index: 8, kind: input, shape index: {}]   ;;  %s1167_s9 = inlined_call_operand.hbm [shape: f32[1,8], index: 9, kind: output, shape index: {}]  }
   0x1   :  { %16 = vsyncpa [#allocation7], 0 }
   0x2   :  { %17 = vsyncpa [#allocation10], 0 }
   0x3   :  { %18 = vsyncpa [#allocation5], 0  ;;  %s1005_s30 = smov [#allocation6]   ;;  %s865_s13 = scalar_lea.hbm %s1159_s1, 128 }
   0x4   :  { %s35_s10 = sshll.u32 %s1005_s30, 4  ;;  %p866_p0 = scmp.ne.s32.totalorder %s1159_s1, %s865_s13  ;;  %s36_s10 = int_to_ptr.vmem [resolvable:$true] %s35_s10 }
   0x5   :  { %p869_p1 = scmp.lt.u32.totalorder %s865_s13, %s1159_s1 }
   0x7   :  { %p871_p2 = pnand %p869_p1, %p866_p0 }
   0x9   :  { %874 = shalt.err (!%p871_p2)
}
   0xa   :  { %s875_s18 = scalar_lea.vmem %s36_s10, 128  ;;  %p880_p4 = scmp.lt.s32.totalorder %s36_s10, %s36_s10 }
   0xb   :  { %p876_p3 = scmp.ne.s32.totalorder %s36_s10, %s875_s18  ;;  %p881_p5 = scmp.lt.s32.totalorder %s875_s18, %s875_s18 }
   0xd   :  { %p882_p6 = por %p881_p5, %p880_p4 }
   0xf   :  { %p883_p7 = pnand %p882_p6, %p876_p3 }
  0x11   :  { %886 = shalt.err (!%p883_p7)
}
  0x12   :  { %38 = dma.hbm_to_vmem [thread:$0]  %s1159_s1, 128, %s36_s10, [#allocation7]  }
  0x13   :  { %s1006_s21 = smov [#allocation9]   ;;  %s1007_s23 = smov [#allocation3]  }
  0x14   :  { %s56_s22 = sshll.u32 %s1006_s21, 4  ;;  %s25_s24 = sshll.u32 %s1007_s23, 4  ;;  %s57_s22 = int_to_ptr.vmem [resolvable:$true] %s56_s22  ;;  %s26_s24 = int_to_ptr.vmem [resolvable:$true] %s25_s24 }
  0x15   :  { %s887_s27 = scalar_lea.hbm %s1161_s3, 1024 }
  0x16   :  { %p888_p8 = scmp.ne.s32.totalorder %s1161_s3, %s887_s27  ;;  %p891_p9 = scmp.lt.u32.totalorder %s887_s27, %s1161_s3 }
  0x18   :  { %p893_p10 = pnand %p891_p9, %p888_p8 }
  0x1a   :  { %896 = shalt.err (!%p893_p10)
}
  0x1b   :  { %s897_s1 = scalar_lea.vmem %s57_s22, 1024  ;;  %p902_p12 = scmp.lt.s32.totalorder %s57_s22, %s57_s22 }
  0x1c   :  { %p898_p11 = scmp.ne.s32.totalorder %s57_s22, %s897_s1  ;;  %p903_p13 = scmp.lt.s32.totalorder %s897_s1, %s897_s1 }
  0x1e   :  { %p904_p0 = por %p903_p13, %p902_p12 }
  0x20   :  { %p905_p1 = pnand %p904_p0, %p898_p11 }
  0x22   :  { %908 = shalt.err (!%p905_p1)
}
  0x23   :  { %s1008_s10 = smov 128   ;;  %s1009_s12 = smov 8  }
  0x24   :  { %62 = dma.hbm_to_vmem [thread:$0]  %s1161_s3, 1024, %s57_s22, [#allocation10], %s1008_s10, %s1008_s10, %s1009_s12  }
  0x25   :  { %s909_s17 = scalar_lea.hbm %s1158_s0, 256 }
  0x26   :  { %p910_p2 = scmp.ne.s32.totalorder %s1158_s0, %s909_s17  ;;  %p913_p3 = scmp.lt.u32.totalorder %s909_s17, %s1158_s0 }
  0x28   :  { %p915_p4 = pnand %p913_p3, %p910_p2 }
  0x2a   :  { %918 = shalt.err (!%p915_p4)
}
  0x2b   :  { %s919_s23 = scalar_lea.vmem %s26_s24, 256  ;;  %p924_p6 = scmp.lt.s32.totalorder %s26_s24, %s26_s24 }
  0x2c   :  { %p920_p5 = scmp.ne.s32.totalorder %s26_s24, %s919_s23  ;;  %p925_p7 = scmp.lt.s32.totalorder %s919_s23, %s919_s23 }
  0x2e   :  { %p926_p8 = por %p925_p7, %p924_p6 }
  0x30   :  { %p927_p9 = pnand %p926_p8, %p920_p5 }
  0x32   :  { %930 = shalt.err (!%p927_p9)
}
  0x33   :  { %28 = dma.hbm_to_vmem [thread:$0]  %s1158_s0, 256, %s26_s24, [#allocation4]  }
  0x34   :  { %s1010_s25 = smov [#allocation8]   ;;  %s1011_s27 = smov [#allocation11]  }
  0x35   :  { %s44_s26 = sshll.u32 %s1010_s25, 4  ;;  %s70_s28 = sshll.u32 %s1011_s27, 4  ;;  %s45_s26 = int_to_ptr.vmem [resolvable:$true] %s44_s26  ;;  %s71_s28 = int_to_ptr.vmem [resolvable:$true] %s70_s28 }
  0x36   :  { %s931_s11 = scalar_lea.hbm %s1160_s2, 4096 }
  0x37   :  { %p932_p10 = scmp.ne.s32.totalorder %s1160_s2, %s931_s11  ;;  %p935_p11 = scmp.lt.u32.totalorder %s931_s11, %s1160_s2 }
  0x39   :  { %p937_p12 = pnand %p935_p11, %p932_p10 }
  0x3b   :  { %940 = shalt.err (!%p937_p12)
}
  0x3c   :  { %s941_s0 = scalar_lea.vmem %s45_s26, 4096  ;;  %p946_p0 = scmp.lt.s32.totalorder %s45_s26, %s45_s26 }
  0x3d   :  { %p942_p13 = scmp.ne.s32.totalorder %s45_s26, %s941_s0  ;;  %p947_p1 = scmp.lt.s32.totalorder %s941_s0, %s941_s0 }
  0x3f   :  { %p948_p2 = por %p947_p1, %p946_p0 }
  0x41   :  { %p949_p3 = pnand %p948_p2, %p942_p13 }
  0x43   :  { %952 = shalt.err (!%p949_p3)
}
  0x44   :  { %50 = dma.hbm_to_vmem [thread:$0]  %s1160_s2, 4096, %s45_s26, [#allocation7], %s1008_s10, %s1008_s10, %s1009_s12  }
  0x45   :  { %s953_s19 = scalar_lea.hbm %s1163_s5, 2048 }
  0x46   :  { %p954_p4 = scmp.ne.s32.totalorder %s1163_s5, %s953_s19  ;;  %p957_p5 = scmp.lt.u32.totalorder %s953_s19, %s1163_s5 }
  0x48   :  { %p959_p6 = pnand %p957_p5, %p954_p4 }
  0x4a   :  { %962 = shalt.err (!%p959_p6)
}
  0x4b   :  { %s963_s22 = scalar_lea.vmem %s71_s28, 2048  ;;  %p968_p8 = scmp.lt.s32.totalorder %s71_s28, %s71_s28 }
  0x4c   :  { %p964_p7 = scmp.ne.s32.totalorder %s71_s28, %s963_s22  ;;  %p969_p9 = scmp.lt.s32.totalorder %s963_s22, %s963_s22 }
  0x4e   :  { %p970_p10 = por %p969_p9, %p968_p8 }
  0x50   :  { %p971_p11 = pnand %p970_p10, %p964_p7 }
  0x52   :  { %974 = shalt.err (!%p971_p11)
}
  0x53   :  { %s1012_s2 = smov 64   ;;  %s1013_s10 = smov 4  }
  0x54   :  { %76 = dma.hbm_to_vmem [thread:$0]  %s1163_s5, 2048, %s71_s28, [#allocation10], %s1012_s2, %s1012_s2, %s1013_s10  }
  0x55   :  { %997 = dma.done.wait [#allocation4], 256  }
  0x56   :  { %998 = vsyncadd [#allocation4], 4294967040 }
  0x57   :  { %999 = dma.done.wait [#allocation7], 4224  }
  0x58   :  { %1000 = vsyncadd [#allocation7], 4294963072 }
  0x59   :  { %1001 = dma.done.wait [#allocation10], 3072  }
  0x5a   :  { %1002 = vsyncadd [#allocation10], 4294964224  ;;  %v1014_v0 = vmov 0   ;;  %v789_v1 = vld [vmem:[#allocation8 + $0x4] ss:$8 sps:$4 sm:$0xff]   ;;  %v103_v26 = vld [vmem:[#allocation6] sm:$0xff] }
  0x5b   :  { %221 = vmatprep.mubr.bf16.mxu0 %v1014_v0  ;;  %v791_v2 = vld [vmem:[#allocation8] ss:$8 sps:$4 sm:$0xff]   ;;  %390 = vmatprep.subr.bf16.mxu1 %v789_v1  ;;  %v792_v3 = vld [vmem:[#allocation8 + $0x14] ss:$8 sps:$4 sm:$0xff]   ;;  %v794_v4 = vld [vmem:[#allocation8 + $0x10] ss:$8 sps:$4 sm:$0xff]   ;;  %v104_v32 = vpack.c.bf16 %v103_v26, %v103_v26 }
  0x5c   :  { %391 = vmatpush1.bf16.msra.mxu1 %v791_v2  ;;  %v795_v5 = vld [vmem:[#allocation8 + $0x24] ss:$8 sps:$4 sm:$0xff]   ;;  %v797_v6 = vld [vmem:[#allocation8 + $0x20] ss:$8 sps:$4 sm:$0xff]   ;;  %v798_v7 = vld [vmem:[#allocation8 + $0x34] ss:$8 sps:$4 sm:$0xff]  }
  0x5d   :  { %392 = vmatprep.subr.bf16.mxu1 %v792_v3  ;;  %v800_v8 = vld [vmem:[#allocation8 + $0x30] ss:$8 sps:$4 sm:$0xff]   ;;  %v801_v9 = vld [vmem:[#allocation8 + $0x44] ss:$8 sps:$4 sm:$0xff]   ;;  %v803_v10 = vld [vmem:[#allocation8 + $0x40] ss:$8 sps:$4 sm:$0xff]   ;;  %v433_v3 = vlaneseq }
  0x5e   :  { %v804_v11 = vld [vmem:[#allocation8 + $0x54] ss:$8 sps:$4 sm:$0xff]   ;;  %v824_v12 = vld [vmem:[#allocation9 + $0x4] ss:$8 sps:$4 sm:$0xff]   ;;  %v827_v13 = vld [vmem:[#allocation9] ss:$8 sps:$4 sm:$0xff]  }
  0x5f   :  { %189 = vmatprep.subr.bf16.mxu0 %v824_v12  ;;  %v806_v14 = vld [vmem:[#allocation8 + $0x50] ss:$8 sps:$4 sm:$0xff]   ;;  %v830_v15 = vld [vmem:[#allocation9 + $0x14] ss:$8 sps:$4 sm:$0xff]   ;;  %v807_v17 = vld [vmem:[#allocation8 + $0x64] ss:$8 sps:$4 sm:$0xff]  }
  0x60   :  { %393 = vmatpush1.bf16.msra.mxu1 %v794_v4  ;;  %190 = vmatpush1.bf16.msra.mxu0 %v827_v13  ;;  %v833_v16 = vld [vmem:[#allocation9 + $0x10] ss:$8 sps:$4 sm:$0xff]   ;;  %v836_v18 = vld [vmem:[#allocation9 + $0x24] ss:$8 sps:$4 sm:$0xff]   ;;  %v809_v19 = vld [vmem:[#allocation8 + $0x60] ss:$8 sps:$4 sm:$0xff]  }
  0x61   :  { %394 = vmatprep.subr.bf16.mxu1 %v795_v5  ;;  %191 = vmatprep.subr.bf16.mxu0 %v830_v15  ;;  %v839_v20 = vld [vmem:[#allocation9 + $0x20] ss:$8 sps:$4 sm:$0xff]   ;;  %v810_v21 = vld [vmem:[#allocation8 + $0x74] ss:$8 sps:$4 sm:$0xff]   ;;  %v812_v23 = vld [vmem:[#allocation8 + $0x70] ss:$8 sps:$4 sm:$0xff]  }
  0x62   :  { %v842_v22 = vld [vmem:[#allocation9 + $0x34] ss:$8 sps:$4 sm:$0xff]   ;;  %v813_v24 = vld [vmem:[#allocation8 + $0x84] ss:$8 sps:$4 sm:$0xff]   ;;  %v845_v25 = vld [vmem:[#allocation9 + $0x30] ss:$8 sps:$4 sm:$0xff]  }
  0x63   :  { %v100_v27 = vld [vmem:[#allocation3 + $0x8] sm:$0xff]  ;;  %v849_v29 = vld [vmem:[#allocation11 + $0x40] sm:$0xff]   ;;  %vm185_vm0 = vcmask 523264   ;;  %v851_v34 = vld [vmem:[#allocation11 + $0x48] sm:$0xff]   ;;  %v434_v4 = vshrl.u32 %v433_v3, 7  ;;  %vm1016_vm1 = vmmov 0  }
  0x64   :  { %395 = vmatpush1.bf16.msra.mxu1 %v797_v6  ;;  %192 = vmatpush1.bf16.msra.mxu0 %v833_v16  ;;  %v102_v28 = vpack.c.bf16 %v100_v27, %v100_v27  ;;  %v815_v30 = vld [vmem:[#allocation8 + $0x80] ss:$8 sps:$4 sm:$0xff]   ;;  %v816_v31 = vld [vmem:[#allocation8 + $0x94] ss:$8 sps:$4 sm:$0xff]   ;;  %v818_v35 = vld [vmem:[#allocation8 + $0x90] ss:$8 sps:$4 sm:$0xff]  }
  0x65   :  { %396 = vmatprep.subr.bf16.mxu1 %v798_v7  ;;  %193 = vmatprep.subr.bf16.mxu0 %v836_v18  ;;  %v850_v33 = vld [vmem:[#allocation11] sm:$0xff]   ;;  %v852_v37 = vld [vmem:[#allocation11 + $0x8] sm:$0xff]   ;;  %v853_v38 = vld [vmem:[#allocation11 + $0x50] sm:$0xff]   ;;  %v435_v5 = vsub.s32 0, %v434_v4  ;;  %v439_v7 = vsub.s32 1, %v434_v4  ;;  %s1017_s1 = smov [#allocation12]  }
  0x66   :  { %422 = vmatprep.mubr.bf16.mxu1 %v102_v28  ;;  %v819_v36 = vld [vmem:[#allocation8 + $0xa4] ss:$8 sps:$4 sm:$0xff]   ;;  %v821_v39 = vld [vmem:[#allocation8 + $0xa0] ss:$8 sps:$4 sm:$0xff]   ;;  %v854_v40 = vld [vmem:[#allocation11 + $0x10] sm:$0xff]   ;;  %s677_s13 = sshll.u32 %s1017_s1, 4  ;;  %s678_s13 = int_to_ptr.vmem [resolvable:$true] %s677_s13 }
  0x67   :  { %v822_v41 = vld [vmem:[#allocation8 + $0xb4] ss:$8 sps:$4 sm:$0xff]   ;;  %v826_v43 = vld [vmem:[#allocation8 + $0xb0] ss:$8 sps:$4 sm:$0xff]   ;;  %v828_v45 = vld [vmem:[#allocation8 + $0xc4] ss:$8 sps:$4 sm:$0xff]   ;;  %p980_p13 = scmp.lt.s32.totalorder %s678_s13, %s678_s13 }
  0x68   :  { %397 = vmatpush1.bf16.msra.mxu1 %v800_v8  ;;  %194 = vmatpush1.bf16.msra.mxu0 %v839_v20  ;;  %v855_v42 = vld [vmem:[#allocation11 + $0x58] sm:$0xff]   ;;  %v857_v46 = vld [vmem:[#allocation11 + $0x60] sm:$0xff]   ;;  %v99_v55 = vld [vmem:[#allocation3] sm:$0xff]  ;;  %vm669_vm2 = vcmask 57344   ;;  %s979_s14 = scalar_lea.vmem %s678_s13, 32 }
  0x69   :  { %398 = vmatprep.subr.bf16.mxu1 %v801_v9  ;;  %195 = vmatprep.subr.bf16.mxu0 %v842_v22  ;;  %v856_v44 = vld [vmem:[#allocation11 + $0x18] sm:$0xff]   ;;  %v832_v47 = vld [vmem:[#allocation8 + $0xc0] ss:$8 sps:$4 sm:$0xff]   ;;  %v840_v51 = vld [vmem:[#allocation8 + $0xe4] ss:$8 sps:$4 sm:$0xff]   ;;  %v101_v56 = vpack.c.bf16 %v99_v55, %v99_v55  ;;  %v1015_v22 = vmov 0.0  }
  0x6a   :  { %v858_v48 = vld [vmem:[#allocation11 + $0x20] sm:$0xff]   ;;  %v834_v49 = vld [vmem:[#allocation8 + $0xd4] ss:$8 sps:$4 sm:$0xff]   ;;  %v838_v50 = vld [vmem:[#allocation8 + $0xd0] ss:$8 sps:$4 sm:$0xff]  }
  0x6b   :  { %v844_v52 = vld [vmem:[#allocation8 + $0xe0] ss:$8 sps:$4 sm:$0xff]   ;;  %v846_v53 = vld [vmem:[#allocation8 + $0xf4] ss:$8 sps:$4 sm:$0xff]   ;;  %v848_v54 = vld [vmem:[#allocation8 + $0xf0] ss:$8 sps:$4 sm:$0xff]  }
  0x6c   :  { %399 = vmatpush1.bf16.msra.mxu1 %v803_v10  ;;  %196 = vmatpush1.bf16.msra.mxu0 %v845_v25  ;;  %v859_v57 = vld [vmem:[#allocation11 + $0x68] sm:$0xff]   ;;  %v861_v59 = vld [vmem:[#allocation11 + $0x70] sm:$0xff]   ;;  %v863_v61 = vld [vmem:[#allocation11 + $0x78] sm:$0xff]  }
  0x6d   :  { %400 = vmatprep.subr.bf16.mxu1 %v804_v11  ;;  %746 = vmatprep.subr.bf16.mxu0 %v849_v29  ;;  %v860_v58 = vld [vmem:[#allocation11 + $0x28] sm:$0xff]   ;;  %v862_v60 = vld [vmem:[#allocation11 + $0x30] sm:$0xff]   ;;  %v864_v62 = vld [vmem:[#allocation11 + $0x38] sm:$0xff]  }
  0x6e   :  { %v431_v6 = vld [vmem:[%s1162_s4] sm:$0x3] }
  0x6f   :  { %696 = vmatmul.mubr.msk.bf16.vlgmr.msra.gmra.mrb[0].mxu0 %vm185_vm0, %v104_v32  ;;  %v436_v8 = vrot.slane %v431_v6, %v435_v5  ;;  %v440_v10 = vrot.slane %v431_v6, %v439_v7  ;;  %v625_v32 = vld [vmem:[%s1165_s7] sm:$0x1] }
  0x70   :  { %401 = vmatpush1.bf16.msra.mxu1 %v806_v14  ;;  %747 = vmatpush3.bf16.msra.mxu0 %v850_v33  ;;  %v628_v33 = vstv %s1166_s8 }
  0x71   :  { %402 = vmatprep.subr.bf16.mxu1 %v807_v17  ;;  %748 = vmatprep.subr.bf16.mxu0 %v851_v34 }
  0x74   :  { %403 = vmatpush1.bf16.msra.mxu1 %v809_v19  ;;  %749 = vmatpush3.bf16.msra.mxu0 %v852_v37 }
  0x75   :  { %404 = vmatprep.subr.bf16.mxu1 %v810_v21  ;;  %750 = vmatprep.subr.bf16.mxu0 %v853_v38 }
  0x78   :  { %405 = vmatpush1.bf16.msra.mxu1 %v812_v23  ;;  %751 = vmatpush3.bf16.msra.mxu0 %v854_v40 }
  0x79   :  { %406 = vmatprep.subr.bf16.mxu1 %v813_v24  ;;  %752 = vmatprep.subr.bf16.mxu0 %v855_v42  ;;  %v729_v24 = vld [vmem:[%s1164_s6] ss:$0 sm:$0xff]  ;;  %s975_s6 = scalar_lea.vmem %s678_s13, 16 }
  0x7a   :  { %p976_p12 = scmp.ne.s32.totalorder %s678_s13, %s975_s6  ;;  %p981_p0 = scmp.lt.s32.totalorder %s979_s14, %s975_s6 }
  0x7c   :  { %407 = vmatpush1.bf16.msra.mxu1 %v815_v30  ;;  %753 = vmatpush3.bf16.msra.mxu0 %v856_v44  ;;  %p982_p1 = por %p981_p0, %p980_p13 }
  0x7d   :  { %408 = vmatprep.subr.bf16.mxu1 %v816_v31  ;;  %754 = vmatprep.subr.bf16.mxu0 %v857_v46 }
  0x7e   :  { %p983_p2 = pnand %p982_p1, %p976_p12 }
  0x80   :  { %409 = vmatpush1.bf16.msra.mxu1 %v818_v35  ;;  %755 = vmatpush3.bf16.msra.mxu0 %v858_v48 }
  0x81   :  { %410 = vmatprep.subr.bf16.mxu1 %v819_v36  ;;  %756 = vmatprep.subr.bf16.mxu0 %v859_v57 }
  0x84   :  { %411 = vmatpush1.bf16.msra.mxu1 %v821_v39  ;;  %757 = vmatpush3.bf16.msra.mxu0 %v860_v58 }
  0x85   :  { %412 = vmatprep.subr.bf16.mxu1 %v822_v41  ;;  %758 = vmatprep.subr.bf16.mxu0 %v861_v59 }
  0x88   :  { %413 = vmatpush1.bf16.msra.mxu1 %v826_v43  ;;  %759 = vmatpush3.bf16.msra.mxu0 %v862_v60 }
  0x89   :  { %414 = vmatprep.subr.bf16.mxu1 %v828_v45  ;;  %760 = vmatprep.subr.bf16.mxu0 %v863_v61 }
  0x8c   :  { %415 = vmatpush1.bf16.msra.mxu1 %v832_v47  ;;  %761 = vmatpush3.bf16.msra.mxu0 %v864_v62 }
  0x8d   :  { %416 = vmatprep.subr.bf16.mxu1 %v834_v49  ;;  %770 = vmatprep.subr.bf16.mxu0 %v1015_v22 }
  0x90   :  { %417 = vmatpush1.bf16.msra.mxu1 %v838_v50 }
  0x91   :  { %418 = vmatprep.subr.bf16.mxu1 %v840_v51 }
  0x94   :  { %419 = vmatpush1.bf16.msra.mxu1 %v844_v52 }
  0x95   :  { %420 = vmatprep.subr.bf16.mxu1 %v846_v53 }
  0x98   :  { %421 = vmatpush1.bf16.msra.mxu1 %v848_v54 }
  0x9b   :  { %423 = vmatmul.mubr.bf16.vlgmr.msra.gmra.mrb[0].mxu1 %v101_v56 }
 0x142   :  { %v223_v63 = vpop.f32.mrb[0].mxu0 }
 0x143   :  { %v225_v0 = vpop.f32.mrb[1].mxu0 }
 0x144   :  { %v227_v1 = vpop.f32.mrb[2].mxu0 }
 0x145   :  { %v228_v2 = vpop.f32.mrb[3].mxu0 }
 0x16e   :  { %v424_v9 = vpop.f32.mrb[0].mxu1 }
 0x16f   :  { %v425_v11 = vadd.f32 %v424_v9, %v223_v63  ;;  %v426_v12 = vpop.f32.mrb[1].mxu1 }
 0x170   :  { %v427_v13 = vadd.f32 %v426_v12, %v225_v0  ;;  %v428_v14 = vpop.f32.mrb[2].mxu1 }
 0x171   :  { %v443_v15 = vadd.f32 %v436_v8, %v425_v11  ;;  %v429_v16 = vpop.f32.mrb[3].mxu1 }
 0x172   :  { %v444_v17 = vadd.f32 %v440_v10, %v427_v13 }
 0x173   :  { %v445_v18 = vmax.f32 %v443_v15, 0.0 }
 0x174   :  { %v446_v19 = vmax.f32 %v444_v17, 0.0 }
 0x175   :  { %v447_v21 = vpack.c.bf16 %v445_v18, %v445_v18 }
 0x176   :  { %v448_v20 = vpack.c.bf16 %v446_v19, %v446_v19 }
 0x178   :  { %616 = vmatprep.mubr.bf16.mxu0 %v448_v20 }
 0x179   :  { %617 = vmatmul.mubr.bf16.vlgmr.msra.gmra.mrb[4].mxu0 %v447_v21 }
 0x17a   :  { %772 = vmatprep.mubr.msk.bf16.mxu0 %vm1016_vm1, %v1015_v22 }
 0x24c   :  { %v762_v23 = vpop.f32.mrb[4].mxu0 }
 0x24d   :  { %v763_v25 = vpop.f32.mrb[5].mxu0 }
 0x24e   :  { %v764_v26 = vadd.f32 %v763_v25, %v762_v23  ;;  %v765_v27 = vpop.f32.mrb[6].mxu0 }
 0x24f   :  { %v766_v28 = vpop.f32.mrb[7].mxu0 }
 0x250   :  { %v619_v29 = vadd.f32 %v764_v26, %v729_v24 }
 0x252   :  { %v624_v30 = vmax.f32 %v619_v29, 0.0 }
 0x254   :  { %v626_v31 = vpack.c.bf16 %v624_v30, %v624_v30 }
 0x256   :  { %771 = vmatpush3.bf16.xpose.msra.mxu0 %v626_v31 }
 0x25d   :  { %773 = vmatmul.mubr.bf16.vlgmr.msra.gmra.mrb[8].mxu0 %v625_v32 }
 0x330   :  { %v663_v34 = vpop.f32.mrb[8].mxu0 }
 0x331   :  { %v664_v35 = vadd.f32 %v663_v34, %v628_v33  ;;  %v774_v36 = vpop.f32.mrb[9].mxu0 }
 0x332   :  { %v666_v37 = vpop.f32.mrb[10].mxu0 }
 0x333   :  { %v775_v38 = vpop.f32.mrb[11].mxu0  ;;  %670 = vst.msk [vmem:[#allocation12] sm:$0x1] %vm669_vm2, %v664_v35 }
 0x334   :  { %986 = shalt.err (!%p983_p2)
}
 0x335   :  { %s987_s15 = scalar_lea.hbm %s1167_s9, 16 }
 0x336   :  { %p988_p3 = scmp.ne.s32.totalorder %s1167_s9, %s987_s15  ;;  %p991_p4 = scmp.lt.u32.totalorder %s987_s15, %s1167_s9 }
 0x338   :  { %p993_p5 = pnand %p991_p4, %p988_p3 }
 0x33a   :  { %996 = shalt.err (!%p993_p5)
}
 0x33b   :  { %680 = dma.vmem_to_hbm [thread:$0]  %s678_s13, 16, %s1167_s9, [#allocation5]  }
 0x33c   :  { %1003 = dma.done.wait [#allocation5], 16  }
 0x33d   :  { %1004 = vsyncadd [#allocation5], 4294967280 }
 0x33e   :  { %684 = vsyncpa [#allocation4], 1 }
 0x33f   :  { %685 = vsyncpa [#allocation7], 1 }
 0x340   :  { %686 = vsyncpa [#allocation10], 1 }
 0x341   :  { %687 = vsyncpa [#allocation5], 1 }

</bundles_post_ra>
